<compile_context>
chip_gen: v7x
topology: tpu7x:2x2x1
jax: 0.10.0
libtpu: 0.0.40
codegen_flags: <defaults>
</compile_context>

<pallas_src>
import jax
import jax.numpy as jnp
from jax.experimental import pallas as pl
from jax.experimental.pallas import tpu as pltpu

SUBLANE = 8  # f32 sublane count


def _round_up(n, m):
    return ((n + m - 1) // m) * m


def mlp_kernel(x_ref, w1_ref, b1_ref, w2_ref, b2_ref, w3_ref, b3_ref, o_ref):
    # fc1 + ReLU
    h = jnp.dot(x_ref[...], w1_ref[...], preferred_element_type=jnp.float32)
    h = jnp.maximum(h + b1_ref[...], 0.0)
    # fc2 + ReLU
    h = jnp.dot(h, w2_ref[...], preferred_element_type=jnp.float32)
    h = jnp.maximum(h + b2_ref[...], 0.0)
    # out (no activation)
    h = jnp.dot(h, w3_ref[...], preferred_element_type=jnp.float32)
    o_ref[...] = (h + b3_ref[...]).astype(o_ref.dtype)


def prepare_params(params):
    """One-time prep: transpose PyTorch (out,in) weights to (in,out), cast to
    f32, and reshape biases to (1, out) rows.  No feature padding: the kernel
    uses natural-width (full-dim) blocks so there is no wasted HBM traffic."""
    return {
        "w1": params["fc1_w"].T.astype(jnp.float32),
        "b1": params["fc1_b"].astype(jnp.float32)[None, :],
        "w2": params["fc2_w"].T.astype(jnp.float32),
        "b2": params["fc2_b"].astype(jnp.float32)[None, :],
        "w3": params["out_w"].T.astype(jnp.float32),
        "b3": params["out_b"].astype(jnp.float32)[None, :],
    }


@jax.jit
def mlp_forward(x, padded):
    """x: (B, in_features). padded: output of prepare_params."""
    B, in_features = x.shape
    out_features = padded["w3"].shape[1]

    # Batch tile selection:
    #  * B <= 256: a single full-dim block (legal even if B % 8 != 0); the run
    #    is overhead-dominated so one grid step is best.
    #  * larger B: ~512-row tiles, guaranteed >= 2 grid steps for megacore;
    #    no rounding of B up to a tile multiple (Pallas handles the ragged
    #    last block: OOB reads are masked, OOB writes dropped).
    if B <= 256:
        tm = B
    else:
        tm = min(512, _round_up(pl.cdiv(B, 2), SUBLANE))
    steps = pl.cdiv(B, tm)

    # Weights/biases: same (whole-array) block every grid step -> VMEM-resident.
    def resident(arr):
        return pl.BlockSpec(arr.shape, lambda i: (0, 0))

    x = x.astype(jnp.float32)

    return pl.pallas_call(
        mlp_kernel,
        out_shape=jax.ShapeDtypeStruct((B, out_features), jnp.float32),
        grid=(steps,),
        in_specs=[
            pl.BlockSpec((tm, in_features), lambda i: (i, 0)),  # x: batch-tiled
            resident(padded["w1"]), resident(padded["b1"]),
            resident(padded["w2"]), resident(padded["b2"]),
            resident(padded["w3"]), resident(padded["b3"]),
        ],
        out_specs=pl.BlockSpec((tm, out_features), lambda i: (i, 0)),
        compiler_params=pltpu.CompilerParams(
            dimension_semantics=("parallel",),   # shards batch across TCs on v7x
            vmem_limit_bytes=32 * 1024 * 1024,
        ),
    )(x, padded["w1"], padded["b1"], padded["w2"], padded["b2"],
      padded["w3"], padded["b3"])


def init_params(key, in_features=16, h1=8, h2=8, out_features=8):
    """Deterministic init matching nn.Linear parameter shapes (out, in)."""
    ks = jax.random.split(key, 6)

    def linear_init(kw, kb, fan_in, fan_out):
        bound = 1.0 / jnp.sqrt(fan_in)
        w = jax.random.uniform(kw, (fan_out, fan_in), jnp.float32, -bound, bound)
        b = jax.random.uniform(kb, (fan_out,), jnp.float32, -bound, bound)
        return w, b

    fc1_w, fc1_b = linear_init(ks[0], ks[1], in_features, h1)
    fc2_w, fc2_b = linear_init(ks[2], ks[3], h1, h2)
    out_w, out_b = linear_init(ks[4], ks[5], h2, out_features)
    return {"fc1_w": fc1_w, "fc1_b": fc1_b,
            "fc2_w": fc2_w, "fc2_b": fc2_b,
            "out_w": out_w, "out_b": out_b}


def reference_forward(x, p):
    h = jnp.maximum(x @ p["fc1_w"].T + p["fc1_b"], 0.0)
    h = jnp.maximum(h @ p["fc2_w"].T + p["fc2_b"], 0.0)
    return h @ p["out_w"].T + p["out_b"]


if __name__ == "__main__":
    key = jax.random.PRNGKey(0)
    kp, kx = jax.random.split(key)

    in_features, h1, h2, out_features = 16, 8, 8, 8
    batch = 8

    params = init_params(kp, in_features, h1, h2, out_features)
    padded = prepare_params(params)          # one-time: transpose weights
    x = jax.random.normal(kx, (batch, in_features), jnp.float32)

    y = mlp_forward(x, padded)
    y = jax.block_until_ready(y)

    y_ref = reference_forward(x, params)
    assert y.shape == (batch, out_features)
    assert jnp.allclose(y, y_ref, atol=1e-5, rtol=1e-5), "mismatch vs reference"

    print("KERNEL_OK")
</pallas_src>

<mosaic_0001>
module attributes {stable_mosaic.version = 11 : i64} {
  func.func @mlp_kernel(%arg0: i32, %arg1: memref<8x16xf32, #tpu.memory_space<vmem>>, %arg2: memref<16x8xf32, #tpu.memory_space<vmem>>, %arg3: memref<1x8xf32, #tpu.memory_space<vmem>>, %arg4: memref<8x8xf32, #tpu.memory_space<vmem>>, %arg5: memref<1x8xf32, #tpu.memory_space<vmem>>, %arg6: memref<8x8xf32, #tpu.memory_space<vmem>>, %arg7: memref<1x8xf32, #tpu.memory_space<vmem>>, %arg8: memref<8x8xf32, #tpu.memory_space<vmem>>) attributes {dimension_semantics = [#tpu.dimension_semantics<parallel>], iteration_bounds = array<i64: 1>, scalar_prefetch = 0 : i64, scratch_operands = 0 : i64, tpu.core_type = #tpu.core_type<tc>, window_params = [{transform_indices = @transform_0, window_bounds = array<i64: 8, 16>}, {pipeline_mode = #tpu.pipeline_mode<synchronous>, transform_indices = @transform_1, window_bounds = array<i64: 16, 8>}, {pipeline_mode = #tpu.pipeline_mode<synchronous>, transform_indices = @transform_2, window_bounds = array<i64: 1, 8>}, {pipeline_mode = #tpu.pipeline_mode<synchronous>, transform_indices = @transform_3, window_bounds = array<i64: 8, 8>}, {pipeline_mode = #tpu.pipeline_mode<synchronous>, transform_indices = @transform_4, window_bounds = array<i64: 1, 8>}, {pipeline_mode = #tpu.pipeline_mode<synchronous>, transform_indices = @transform_5, window_bounds = array<i64: 8, 8>}, {pipeline_mode = #tpu.pipeline_mode<synchronous>, transform_indices = @transform_6, window_bounds = array<i64: 1, 8>}, {transform_indices = @transform_7, window_bounds = array<i64: 8, 8>}]} {
    %c0 = arith.constant 0 : index
    %c0_0 = arith.constant 0 : index
    %0 = vector.load %arg1[%c0, %c0_0] : memref<8x16xf32, #tpu.memory_space<vmem>>, vector<8x16xf32>
    %c0_1 = arith.constant 0 : index
    %c0_2 = arith.constant 0 : index
    %1 = vector.load %arg2[%c0_1, %c0_2] : memref<16x8xf32, #tpu.memory_space<vmem>>, vector<16x8xf32>
    %cst = arith.constant dense<0.000000e+00> : vector<8x8xf32>
    %2 = tpu.matmul %0, %1, %cst {dimension_numbers = #tpu.dot_dimension_numbers<[1], [0], [0], [1], [0, 0, 1, 1], [], []>} : vector<8x16xf32>, vector<16x8xf32>, vector<8x8xf32> -> vector<8x8xf32>
    %c0_3 = arith.constant 0 : index
    %c0_4 = arith.constant 0 : index
    %3 = vector.load %arg3[%c0_3, %c0_4] : memref<1x8xf32, #tpu.memory_space<vmem>>, vector<1x8xf32>
    %4 = vector.broadcast %3 : vector<1x8xf32> to vector<8x8xf32>
    %5 = arith.addf %2, %4 : vector<8x8xf32>
    %cst_5 = arith.constant 0.000000e+00 : f32
    %6 = vector.broadcast %cst_5 : f32 to vector<8x8xf32>
    %7 = arith.maximumf %5, %6 : vector<8x8xf32>
    %c0_6 = arith.constant 0 : index
    %c0_7 = arith.constant 0 : index
    %8 = vector.load %arg4[%c0_6, %c0_7] : memref<8x8xf32, #tpu.memory_space<vmem>>, vector<8x8xf32>
    %cst_8 = arith.constant dense<0.000000e+00> : vector<8x8xf32>
    %9 = tpu.matmul %7, %8, %cst_8 {dimension_numbers = #tpu.dot_dimension_numbers<[1], [0], [0], [1], [0, 0, 1, 1], [], []>} : vector<8x8xf32>, vector<8x8xf32>, vector<8x8xf32> -> vector<8x8xf32>
    %c0_9 = arith.constant 0 : index
    %c0_10 = arith.constant 0 : index
    %10 = vector.load %arg5[%c0_9, %c0_10] : memref<1x8xf32, #tpu.memory_space<vmem>>, vector<1x8xf32>
    %11 = vector.broadcast %10 : vector<1x8xf32> to vector<8x8xf32>
    %12 = arith.addf %9, %11 : vector<8x8xf32>
    %cst_11 = arith.constant 0.000000e+00 : f32
    %13 = vector.broadcast %cst_11 : f32 to vector<8x8xf32>
    %14 = arith.maximumf %12, %13 : vector<8x8xf32>
    %c0_12 = arith.constant 0 : index
    %c0_13 = arith.constant 0 : index
    %15 = vector.load %arg6[%c0_12, %c0_13] : memref<8x8xf32, #tpu.memory_space<vmem>>, vector<8x8xf32>
    %cst_14 = arith.constant dense<0.000000e+00> : vector<8x8xf32>
    %16 = tpu.matmul %14, %15, %cst_14 {dimension_numbers = #tpu.dot_dimension_numbers<[1], [0], [0], [1], [0, 0, 1, 1], [], []>} : vector<8x8xf32>, vector<8x8xf32>, vector<8x8xf32> -> vector<8x8xf32>
    %c0_15 = arith.constant 0 : index
    %c0_16 = arith.constant 0 : index
    %17 = vector.load %arg7[%c0_15, %c0_16] : memref<1x8xf32, #tpu.memory_space<vmem>>, vector<1x8xf32>
    %18 = vector.broadcast %17 : vector<1x8xf32> to vector<8x8xf32>
    %19 = arith.addf %16, %18 : vector<8x8xf32>
    %c0_17 = arith.constant 0 : index
    %c0_18 = arith.constant 0 : index
    %20 = vector.load %arg8[%c0_17, %c0_18] : memref<8x8xf32, #tpu.memory_space<vmem>>, vector<8x8xf32>
    tpu.vector_store %arg8[%c0_17, %c0_18], %19 {strides = array<i32>} : memref<8x8xf32, #tpu.memory_space<vmem>>, vector<8x8xf32>,
    return
  }
  func.func @transform_0(%arg0: i32) -> (i32, i32) {
    %c0_i32 = arith.constant 0 : i32
    %c0_i32_0 = arith.constant 0 : i32
    return %arg0, %c0_i32 : i32, i32
  }
  func.func @transform_1(%arg0: i32) -> (i32, i32) {
    %c0_i32 = arith.constant 0 : i32
    %c0_i32_0 = arith.constant 0 : i32
    %c0_i32_1 = arith.constant 0 : i32
    return %c0_i32, %c0_i32_0 : i32, i32
  }
  func.func @transform_2(%arg0: i32) -> (i32, i32) {
    %c0_i32 = arith.constant 0 : i32
    %c0_i32_0 = arith.constant 0 : i32
    %c0_i32_1 = arith.constant 0 : i32
    return %c0_i32, %c0_i32_0 : i32, i32
  }
  func.func @transform_3(%arg0: i32) -> (i32, i32) {
    %c0_i32 = arith.constant 0 : i32
    %c0_i32_0 = arith.constant 0 : i32
    %c0_i32_1 = arith.constant 0 : i32
    return %c0_i32, %c0_i32_0 : i32, i32
  }
  func.func @transform_4(%arg0: i32) -> (i32, i32) {
    %c0_i32 = arith.constant 0 : i32
    %c0_i32_0 = arith.constant 0 : i32
    %c0_i32_1 = arith.constant 0 : i32
    return %c0_i32, %c0_i32_0 : i32, i32
  }
  func.func @transform_5(%arg0: i32) -> (i32, i32) {
    %c0_i32 = arith.constant 0 : i32
    %c0_i32_0 = arith.constant 0 : i32
    %c0_i32_1 = arith.constant 0 : i32
    return %c0_i32, %c0_i32_0 : i32, i32
  }
  func.func @transform_6(%arg0: i32) -> (i32, i32) {
    %c0_i32 = arith.constant 0 : i32
    %c0_i32_0 = arith.constant 0 : i32
    %c0_i32_1 = arith.constant 0 : i32
    return %c0_i32, %c0_i32_0 : i32, i32
  }
  func.func @transform_7(%arg0: i32) -> (i32, i32) {
    %c0_i32 = arith.constant 0 : i32
    %c0_i32_0 = arith.constant 0 : i32
    return %arg0, %c0_i32 : i32, i32
  }
}

</mosaic_0001>

<bundles_post_ra>
// kernel: mlp_forward.1
= control target key start
LH: loop header
LB: loop body
LE: loop exit
PB: predicated region body
PF: predicated region fallthrough
CT: control target
= control target key end

     0   :  { %v352_v2 = vmov 0.0|0.0   ;;  %vm353_vm0 = vmmov 0   ;;  %v354_v4 = vmov 0.0   ;;  %s438_s0 = inlined_call_operand.vmem [shape: f32[8,16], index: 0, kind: input, shape index: {}]   ;;  %s439_s1 = inlined_call_operand.vmem [shape: f32[16,8], index: 1, kind: input, shape index: {}]   ;;  %s440_s2 = inlined_call_operand.vmem [shape: f32[1,8], index: 2, kind: input, shape index: {}]   ;;  %s441_s3 = inlined_call_operand.vmem [shape: f32[8,8], index: 3, kind: input, shape index: {}]   ;;  %s442_s4 = inlined_call_operand.vmem [shape: f32[1,8], index: 4, kind: input, shape index: {}]   ;;  %s443_s5 = inlined_call_operand.vmem [shape: f32[8,8], index: 5, kind: input, shape index: {}]   ;;  %s444_s6 = inlined_call_operand.vmem [shape: f32[1,8], index: 6, kind: input, shape index: {}]   ;;  %s445_s7 = inlined_call_operand.hbm [shape: f32[8,8], index: 7, kind: output, shape index: {}]  }
   0x1   :  { %v28_v0 = vld [vmem:[%s439_s1] sm:$0xff]  ;;  %v29_v1 = vld [vmem:[%s439_s1 + $0x8] sm:$0xff]  ;;  %321 = vmatprep.subr.bf16.mxu0 %v352_v2  ;;  %308 = vmatprep.mubr.msk.f32.mxu0 %vm353_vm0, %v354_v4 }
   0x2   :  { %v322_v3 = vpack.c.bf16 %v29_v1, %v28_v0 }
   0x3   :  { %12 = vsyncpa [#allocation3], 0  ;;  %311 = vmatprep.subr.mxu1 %v354_v4  ;;  %313 = vmatprep.mubr.msk.f32.mxu1 %vm353_vm0, %v354_v4  ;;  %v27_v5 = vld [vmem:[%s438_s0] sm:$0xff]  ;;  %vm37_vm1 = vcmask 130048   ;;  %vm120_vm2 = vcmask 64512   ;;  %s355_s13 = smov [#allocation2]  }
   0x4   :  { %323 = vmatpush3.bf16.msra.mxu0 %v322_v3  ;;  %v112_v6 = vld [vmem:[%s441_s3] sm:$0xff]  ;;  %s283_s14 = sshll.u32 %s355_s13, 4  ;;  %s284_s14 = int_to_ptr.vmem [resolvable:$true] %s283_s14 }
   0x5   :  { %312 = vmatpush3.msra.mxu1 %v112_v6  ;;  %v291_v7 = vld [vmem:[%s440_s2] ss:$0 sm:$0xff]  ;;  %p333_p1 = scmp.lt.s32.totalorder %s284_s14, %s284_s14 }
   0x6   :  { %316 = vmatprep.subr.mxu1 %v354_v4  ;;  %v195_v12 = vld [vmem:[%s443_s5] sm:$0xff]  ;;  %s328_s5 = scalar_lea.vmem %s284_s14, 128 }
   0x7   :  { %309 = vmatmul.mubr.msk.f32.vlgmr.msra.gmra.mrb[0].mxu0 %vm37_vm1, %v27_v5  ;;  %v293_v13 = vld [vmem:[%s442_s4] ss:$0 sm:$0xff]  ;;  %p329_p0 = scmp.ne.s32.totalorder %s284_s14, %s328_s5  ;;  %p334_p2 = scmp.lt.s32.totalorder %s328_s5, %s328_s5 }
   0x8   :  { %v295_v18 = vld [vmem:[%s444_s6] ss:$0 sm:$0xff] }
   0x9   :  { %p335_p3 = por %p334_p2, %p333_p1 }
   0xb   :  { %p336_p4 = pnand %p335_p3, %p329_p0 }
  0xda   :  { %v107_v8 = vpop.f32.mrb[0].mxu0 }
  0xdb   :  { %v108_v9 = vadd.f32 %v291_v7, %v107_v8  ;;  %v310_v10 = vpop.f32.mrb[1].mxu0 }
  0xdd   :  { %v111_v11 = vmax.f32 %v108_v9, 0.0 }
  0xdf   :  { %314 = vmatmul.mubr.msk.f32.vlgmr.msra.gmra.mrb[0].mxu1 %vm120_vm2, %v111_v11 }
  0xe0   :  { %318 = vmatprep.mubr.msk.f32.mxu1 %vm353_vm0, %v354_v4  ;;  %317 = vmatpush3.msra.mxu1 %v195_v12 }
 0x1b2   :  { %v190_v14 = vpop.f32.mrb[0].mxu1 }
 0x1b3   :  { %v191_v15 = vadd.f32 %v293_v13, %v190_v14  ;;  %v315_v16 = vpop.f32.mrb[1].mxu1 }
 0x1b5   :  { %v194_v17 = vmax.f32 %v191_v15, 0.0 }
 0x1b7   :  { %319 = vmatmul.mubr.msk.f32.vlgmr.msra.gmra.mrb[2].mxu1 %vm120_vm2, %v194_v17 }
 0x28a   :  { %v272_v19 = vpop.f32.mrb[2].mxu1 }
 0x28b   :  { %v273_v20 = vadd.f32 %v295_v18, %v272_v19  ;;  %v320_v21 = vpop.f32.mrb[3].mxu1 }
 0x28d   :  { %276 = vst.msk [vmem:[#allocation2] sm:$0xff] %vm120_vm2, %v273_v20 }
 0x28e   :  { %339 = shalt.err (!%p336_p4)
}
 0x28f   :  { %s340_s16 = scalar_lea.hbm %s445_s7, 128 }
 0x290   :  { %p341_p5 = scmp.ne.s32.totalorder %s445_s7, %s340_s16  ;;  %p344_p6 = scmp.lt.u32.totalorder %s340_s16, %s445_s7 }
 0x292   :  { %p346_p7 = pnand %p344_p6, %p341_p5 }
 0x294   :  { %349 = shalt.err (!%p346_p7)
}
 0x295   :  { %286 = dma.vmem_to_hbm [thread:$0]  %s284_s14, 128, %s445_s7, [#allocation3]  }
 0x296   :  { %350 = dma.done.wait [#allocation3], 128  }
 0x297   :  { %351 = vsyncadd [#allocation3], 4294967168 }
 0x298   :  { %290 = vsyncpa [#allocation3], 1 }

</bundles_post_ra>
